<compile_context>
chip_gen: v5e
topology: v5e:2x2
jax: 0.10.0
libtpu: 0.0.40
codegen_flags: <defaults>
</compile_context>

<pallas_src>
import functools

import jax
import jax.numpy as jnp
from jax.experimental import pallas as pl
from jax.experimental.pallas import tpu as pltpu

SMOOTH = 1e-5          # the local `smooth` hardcoded inside forward()
NUM_CLASSES = 3        # forward() hardcodes bg / label1 / label2
LANES = 128
MAX_TILE_ROWS = 2048   # rows of 128 lanes per spatial tile (multiple of 8)


def _round_up(x, m):
    return ((x + m - 1) // m) * m


def _pick_tile_rows(rows):
    """Pick a tile height (multiple of 8, <= MAX_TILE_ROWS) minimizing padding."""
    if rows <= MAX_TILE_ROWS:
        return _round_up(rows, 8)          # single tile
    best_tr = MAX_TILE_ROWS
    best_pad = _round_up(rows, best_tr)
    for cand in range(MAX_TILE_ROWS - 8, MAX_TILE_ROWS // 2 - 1, -8):
        padded = _round_up(rows, cand)
        if padded < best_pad:
            best_tr, best_pad = cand, padded
    return best_tr


def _dice_loss_kernel(pred_ref, gt_ref, out_ref, inter_acc, z_acc, y_acc, *,
                      has_padding):
    # pred_ref: (1, C, TR, 128) input-dtype   gt_ref: (1, TR, 128) int32
    # out_ref : (1, 1) f32
    # *_acc   : (C, 8, 128) f32 VMEM scratch, carried across the whole grid
    b = pl.program_id(0)
    t = pl.program_id(1)
    nb = pl.num_programs(0)
    nt = pl.num_programs(1)

    @pl.when(jnp.logical_and(b == 0, t == 0))
    def _init():
        inter_acc[...] = jnp.zeros_like(inter_acc)
        z_acc[...] = jnp.zeros_like(z_acc)
        y_acc[...] = jnp.zeros_like(y_acc)

    tr = pred_ref.shape[2]                             # static
    logits = pred_ref[0].astype(jnp.float32)           # (C, TR, 128)
    gt = gt_ref[0]                                     # (TR, 128) int32

    # Channel softmax.  C is a leading axis, so max/sum over it are plain
    # vreg-wise VPU ops.  One approx reciprocal (EUP slot) + C multiplies
    # instead of C divides.
    m = jnp.max(logits, axis=0, keepdims=True)
    e = jnp.exp(logits - m)
    denom = jnp.sum(e, axis=0, keepdims=True)
    p = e * pl.reciprocal(denom, approx=True)          # (C, TR, 128)

    labels = jnp.stack(
        [(gt == i).astype(jnp.float32) for i in range(NUM_CLASSES)], axis=0
    )                                                  # (C, TR, 128)

    def tile_reduce(x):
        # (C, TR, 128) -> (C, 8, 128): the reshape keeps every (8,128) vreg
        # intact and the sum runs along a leading axis -> pure cross-vreg VPU
        # adds.  All cross-lane (XLU) work is deferred to the finalize step.
        return jnp.sum(x.reshape(NUM_CLASSES, tr // 8, 8, LANES), axis=1)

    # Tiny accumulator read-modify-writes only (9 loads + 9 stores per tile).
    inter_acc[...] += tile_reduce(p * labels)
    y_acc[...] += tile_reduce(labels)

    if has_padding:
        # Padded pixels (gt == -1, zero logits) only ever land in the last
        # spatial tile of each batch element -> mask p out of z_sum only there.
        last_tile = t == nt - 1

        @pl.when(last_tile)
        def _z_masked():
            valid = (gt >= 0).astype(jnp.float32)
            z_acc[...] += tile_reduce(p * valid[None])

        @pl.when(jnp.logical_not(last_tile))
        def _z_plain():
            z_acc[...] += tile_reduce(p)
    else:
        z_acc[...] += tile_reduce(p)

    @pl.when(jnp.logical_and(b == nb - 1, t == nt - 1))
    def _finalize():
        loss_acc = jnp.float32(0.0)
        for i in range(NUM_CLASSES):                   # static unroll, C == 3
            intersect = jnp.sum(inter_acc[i])
            z_sum = jnp.sum(z_acc[i])
            y_sum = jnp.sum(y_acc[i])
            loss_acc = loss_acc + (2.0 * intersect + SMOOTH) / (z_sum + y_sum + SMOOTH)
        loss = 1.0 - loss_acc / jnp.float32(NUM_CLASSES)
        out_ref[...] = jnp.full((1, 1), loss, dtype=jnp.float32)


def dice_loss(pred, gt):
    """pred: (B, C, H, W) float logits, gt: (B, 1, H, W) int labels in {0,1,2}."""
    B, C, H, W = pred.shape
    assert C == NUM_CLASSES, "forward() hardcodes 3 label channels"
    S = H * W

    # Lane-dense layout: S -> (rows, 128); pick a spatial tile of TR rows.
    rows = pl.cdiv(S, LANES)
    tile_rows = _pick_tile_rows(rows)
    rows_pad = _round_up(rows, tile_rows)
    n_tiles = rows_pad // tile_rows
    s_pad = rows_pad * LANES
    has_padding = (s_pad != S)

    pred_flat = pred.reshape(B, C, S)                  # keep dtype; upcast in-kernel
    gt_flat = gt.reshape(B, S)
    if gt_flat.dtype != jnp.int32:
        gt_flat = gt_flat.astype(jnp.int32)            # stream labels as native int32
    if has_padding:
        pad = s_pad - S
        pred_flat = jnp.pad(pred_flat, ((0, 0), (0, 0), (0, pad)))
        gt_flat = jnp.pad(gt_flat, ((0, 0), (0, pad)), constant_values=-1)
    pred4 = pred_flat.reshape(B, C, rows_pad, LANES)
    gt3 = gt_flat.reshape(B, rows_pad, LANES)

    cost = pl.CostEstimate(
        flops=int(B * rows_pad * LANES * (6 * C + 8)),
        transcendentals=int(B * rows_pad * LANES * C),
        bytes_accessed=int(pred4.size * pred4.dtype.itemsize + gt3.size * 4 + 4),
    )

    kernel = functools.partial(_dice_loss_kernel, has_padding=has_padding)

    out = pl.pallas_call(
        kernel,
        out_shape=jax.ShapeDtypeStruct((1, 1), jnp.float32),
        grid=(B, n_tiles),
        in_specs=[
            pl.BlockSpec((1, C, tile_rows, LANES), lambda b, t: (b, 0, t, 0)),
            pl.BlockSpec((1, tile_rows, LANES), lambda b, t: (b, t, 0)),
        ],
        out_specs=pl.BlockSpec((1, 1), lambda b, t: (0, 0)),
        scratch_shapes=[
            pltpu.VMEM((NUM_CLASSES, 8, LANES), jnp.float32),  # intersect partials
            pltpu.VMEM((NUM_CLASSES, 8, LANES), jnp.float32),  # z_sum partials
            pltpu.VMEM((NUM_CLASSES, 8, LANES), jnp.float32),  # y_sum partials
        ],
        compiler_params=pltpu.CompilerParams(
            dimension_semantics=("arbitrary", "arbitrary"),
            vmem_limit_bytes=48 * 1024 * 1024,   # 2048-row f32 tiles + headroom (v7x-safe)
        ),
        cost_estimate=cost,
    )(pred4, gt3)
    return out[0, 0]


def dice_loss_ref(pred, gt):
    """Pure-JAX reference mirroring the PyTorch forward()."""
    B, C, H, W = pred.shape
    p = jax.nn.softmax(pred.astype(jnp.float32), axis=1)
    gt_sq = gt.reshape(B, H, W)
    loss = 0.0
    for i in range(C):
        label_i = (gt_sq == i).astype(jnp.float32)
        intersect = jnp.sum(p[:, i] * label_i)
        z_sum = jnp.sum(p[:, i])
        y_sum = jnp.sum(label_i)
        loss = loss + (2.0 * intersect + SMOOTH) / (z_sum + y_sum + SMOOTH)
    return 1.0 - loss / C


if __name__ == "__main__":
    key = jax.random.PRNGKey(0)
    k_pred, k_gt = jax.random.split(key)

    B, C, H, W = 2, 3, 16, 16   # forward() hardcodes 3 label channels
    pred = jax.random.normal(k_pred, (B, C, H, W), dtype=jnp.float32)
    gt = jax.random.randint(k_gt, (B, 1, H, W), 0, 3, dtype=jnp.int32)

    out = dice_loss(pred, gt)
    jax.block_until_ready(out)

    ref = dice_loss_ref(pred, gt)
    # approx=True reciprocal introduces ~1e-4 relative error in the softmax;
    # the loss is O(0.5), so 1e-3 tolerance is ample.
    assert jnp.allclose(out, ref, atol=1e-3, rtol=1e-3), (out, ref)

    print("KERNEL_OK")
</pallas_src>

<mosaic_0001>
module attributes {stable_mosaic.version = 11 : i64} {
  func.func @_dice_loss_kernel(%arg0: i32, %arg1: i32, %arg2: memref<1x3x8x128xf32, #tpu.memory_space<vmem>>, %arg3: memref<1x8x128xi32, #tpu.memory_space<vmem>>, %arg4: memref<1x1xf32, #tpu.memory_space<vmem>>, %arg5: memref<3x8x128xf32, #tpu.memory_space<vmem>>, %arg6: memref<3x8x128xf32, #tpu.memory_space<vmem>>, %arg7: memref<3x8x128xf32, #tpu.memory_space<vmem>>) attributes {dimension_semantics = [#tpu.dimension_semantics<arbitrary>, #tpu.dimension_semantics<arbitrary>], iteration_bounds = array<i64: 2, 1>, scalar_prefetch = 0 : i64, scratch_operands = 3 : i64, tpu.core_type = #tpu.core_type<tc>, window_params = [{transform_indices = @transform_0, window_bounds = array<i64: 1, 3, 8, 128>}, {transform_indices = @transform_1, window_bounds = array<i64: 1, 8, 128>}, {pipeline_mode = #tpu.pipeline_mode<synchronous>, transform_indices = @transform_2, window_bounds = array<i64: 1, 1>}]} {
    %c0_i32 = arith.constant 0 : i32
    %0 = arith.cmpi eq, %arg0, %c0_i32 : i32
    %c0_i32_0 = arith.constant 0 : i32
    %1 = arith.cmpi eq, %arg1, %c0_i32_0 : i32
    %2 = arith.andi %0, %1 : i1
    %3 = arith.extui %2 : i1 to i32
    %c0_i32_1 = arith.constant 0 : i32
    %4 = arith.cmpi ne, %3, %c0_i32_1 : i32
    scf.if %4 {
      %cst_30 = arith.constant 0.000000e+00 : f32
      %57 = vector.broadcast %cst_30 : f32 to vector<3x8x128xf32>
      %c0_31 = arith.constant 0 : index
      %c0_32 = arith.constant 0 : index
      %c0_33 = arith.constant 0 : index
      %58 = vector.load %arg5[%c0_31, %c0_32, %c0_33] : memref<3x8x128xf32, #tpu.memory_space<vmem>>, vector<3x8x128xf32>
      tpu.vector_store %arg5[%c0_31, %c0_32, %c0_33], %57 {strides = array<i32>} : memref<3x8x128xf32, #tpu.memory_space<vmem>>, vector<3x8x128xf32>,
      %cst_34 = arith.constant 0.000000e+00 : f32
      %59 = vector.broadcast %cst_34 : f32 to vector<3x8x128xf32>
      %c0_35 = arith.constant 0 : index
      %c0_36 = arith.constant 0 : index
      %c0_37 = arith.constant 0 : index
      %60 = vector.load %arg6[%c0_35, %c0_36, %c0_37] : memref<3x8x128xf32, #tpu.memory_space<vmem>>, vector<3x8x128xf32>
      tpu.vector_store %arg6[%c0_35, %c0_36, %c0_37], %59 {strides = array<i32>} : memref<3x8x128xf32, #tpu.memory_space<vmem>>, vector<3x8x128xf32>,
      %cst_38 = arith.constant 0.000000e+00 : f32
      %61 = vector.broadcast %cst_38 : f32 to vector<3x8x128xf32>
      %c0_39 = arith.constant 0 : index
      %c0_40 = arith.constant 0 : index
      %c0_41 = arith.constant 0 : index
      %62 = vector.load %arg7[%c0_39, %c0_40, %c0_41] : memref<3x8x128xf32, #tpu.memory_space<vmem>>, vector<3x8x128xf32>
      tpu.vector_store %arg7[%c0_39, %c0_40, %c0_41], %61 {strides = array<i32>} : memref<3x8x128xf32, #tpu.memory_space<vmem>>, vector<3x8x128xf32>,
    } else {
    }
    %c0 = arith.constant 0 : index
    %c0_2 = arith.constant 0 : index
    %c0_3 = arith.constant 0 : index
    %c0_4 = arith.constant 0 : index
    %5 = vector.load %arg2[%c0, %c0_2, %c0_3, %c0_4] : memref<1x3x8x128xf32, #tpu.memory_space<vmem>>, vector<1x3x8x128xf32>
    %6 = vector.shape_cast %5 : vector<1x3x8x128xf32> to vector<3x8x128xf32>
    %c0_5 = arith.constant 0 : index
    %c0_6 = arith.constant 0 : index
    %c0_7 = arith.constant 0 : index
    %7 = vector.load %arg3[%c0_5, %c0_6, %c0_7] : memref<1x8x128xi32, #tpu.memory_space<vmem>>, vector<1x8x128xi32>
    %8 = vector.shape_cast %7 : vector<1x8x128xi32> to vector<8x128xi32>
    %cst = arith.constant dense<0xFF800000> : vector<8x128xf32>
    %9 = vector.multi_reduction <maximumf>, %6, %cst [0] : vector<3x8x128xf32> to vector<8x128xf32>
    %10 = vector.shape_cast %9 : vector<8x128xf32> to vector<1x8x128xf32>
    %11 = vector.broadcast %10 : vector<1x8x128xf32> to vector<3x8x128xf32>
    %12 = arith.subf %6, %11 : vector<3x8x128xf32>
    %13 = math.exp %12 : vector<3x8x128xf32>
    %cst_8 = arith.constant dense<0.000000e+00> : vector<8x128xf32>
    %14 = vector.multi_reduction <add>, %13, %cst_8 [0] : vector<3x8x128xf32> to vector<8x128xf32>
    %15 = vector.shape_cast %14 : vector<8x128xf32> to vector<1x8x128xf32>
    %16 = tpu.reciprocal %15 {approx = true} : vector<1x8x128xf32> -> vector<1x8x128xf32>
    %17 = vector.broadcast %16 : vector<1x8x128xf32> to vector<3x8x128xf32>
    %18 = arith.mulf %13, %17 : vector<3x8x128xf32>
    %c0_i32_9 = arith.constant 0 : i32
    %19 = vector.broadcast %c0_i32_9 : i32 to vector<8x128xi32>
    %20 = arith.cmpi eq, %8, %19 : vector<8x128xi32>
    %21 = arith.extui %20 : vector<8x128xi1> to vector<8x128xi32>
    %22 = arith.sitofp %21 : vector<8x128xi32> to vector<8x128xf32>
    %c1_i32 = arith.constant 1 : i32
    %23 = vector.broadcast %c1_i32 : i32 to vector<8x128xi32>
    %24 = arith.cmpi eq, %8, %23 : vector<8x128xi32>
    %25 = arith.extui %24 : vector<8x128xi1> to vector<8x128xi32>
    %26 = arith.sitofp %25 : vector<8x128xi32> to vector<8x128xf32>
    %c2_i32 = arith.constant 2 : i32
    %27 = vector.broadcast %c2_i32 : i32 to vector<8x128xi32>
    %28 = arith.cmpi eq, %8, %27 : vector<8x128xi32>
    %29 = arith.extui %28 : vector<8x128xi1> to vector<8x128xi32>
    %30 = arith.sitofp %29 : vector<8x128xi32> to vector<8x128xf32>
    %31 = vector.shape_cast %22 : vector<8x128xf32> to vector<1x8x128xf32>
    %32 = vector.shape_cast %26 : vector<8x128xf32> to vector<1x8x128xf32>
    %33 = vector.shape_cast %30 : vector<8x128xf32> to vector<1x8x128xf32>
    %34 = tpu.concatenate %31, %32, %33 in 0 : vector<1x8x128xf32>, vector<1x8x128xf32>, vector<1x8x128xf32> -> vector<3x8x128xf32>
    %c0_10 = arith.constant 0 : index
    %c0_11 = arith.constant 0 : index
    %c0_12 = arith.constant 0 : index
    %35 = vector.load %arg5[%c0_10, %c0_11, %c0_12] : memref<3x8x128xf32, #tpu.memory_space<vmem>>, vector<3x8x128xf32>
    %36 = arith.mulf %18, %34 : vector<3x8x128xf32>
    %37 = vector.shape_cast %36 : vector<3x8x128xf32> to vector<3x1x8x128xf32>
    %cst_13 = arith.constant dense<0.000000e+00> : vector<3x8x128xf32>
    %38 = vector.multi_reduction <add>, %37, %cst_13 [1] : vector<3x1x8x128xf32> to vector<3x8x128xf32>
    %39 = arith.addf %35, %38 : vector<3x8x128xf32>
    %c0_14 = arith.constant 0 : index
    %c0_15 = arith.constant 0 : index
    %c0_16 = arith.constant 0 : index
    %40 = vector.load %arg5[%c0_14, %c0_15, %c0_16] : memref<3x8x128xf32, #tpu.memory_space<vmem>>, vector<3x8x128xf32>
    tpu.vector_store %arg5[%c0_14, %c0_15, %c0_16], %39 {strides = array<i32>} : memref<3x8x128xf32, #tpu.memory_space<vmem>>, vector<3x8x128xf32>,
    %c0_17 = arith.constant 0 : index
    %c0_18 = arith.constant 0 : index
    %c0_19 = arith.constant 0 : index
    %41 = vector.load %arg7[%c0_17, %c0_18, %c0_19] : memref<3x8x128xf32, #tpu.memory_space<vmem>>, vector<3x8x128xf32>
    %42 = vector.shape_cast %34 : vector<3x8x128xf32> to vector<3x1x8x128xf32>
    %cst_20 = arith.constant dense<0.000000e+00> : vector<3x8x128xf32>
    %43 = vector.multi_reduction <add>, %42, %cst_20 [1] : vector<3x1x8x128xf32> to vector<3x8x128xf32>
    %44 = arith.addf %41, %43 : vector<3x8x128xf32>
    %c0_21 = arith.constant 0 : index
    %c0_22 = arith.constant 0 : index
    %c0_23 = arith.constant 0 : index
    %45 = vector.load %arg7[%c0_21, %c0_22, %c0_23] : memref<3x8x128xf32, #tpu.memory_space<vmem>>, vector<3x8x128xf32>
    tpu.vector_store %arg7[%c0_21, %c0_22, %c0_23], %44 {strides = array<i32>} : memref<3x8x128xf32, #tpu.memory_space<vmem>>, vector<3x8x128xf32>,
    %c0_i32_24 = arith.constant 0 : i32
    %46 = arith.cmpi eq, %arg1, %c0_i32_24 : i32
    %47 = arith.extui %46 : i1 to i32
    %c0_i32_25 = arith.constant 0 : i32
    %48 = arith.cmpi ne, %47, %c0_i32_25 : i32
    scf.if %48 {
      %c0_i32_30 = arith.constant 0 : i32
      %57 = vector.broadcast %c0_i32_30 : i32 to vector<8x128xi32>
      %58 = arith.cmpi sge, %8, %57 : vector<8x128xi32>
      %59 = arith.extui %58 : vector<8x128xi1> to vector<8x128xi32>
      %60 = arith.sitofp %59 : vector<8x128xi32> to vector<8x128xf32>
      %c0_31 = arith.constant 0 : index
      %c0_32 = arith.constant 0 : index
      %c0_33 = arith.constant 0 : index
      %61 = vector.load %arg6[%c0_31, %c0_32, %c0_33] : memref<3x8x128xf32, #tpu.memory_space<vmem>>, vector<3x8x128xf32>
      %62 = vector.shape_cast %60 : vector<8x128xf32> to vector<1x8x128xf32>
      %63 = vector.broadcast %62 : vector<1x8x128xf32> to vector<3x8x128xf32>
      %64 = arith.mulf %18, %63 : vector<3x8x128xf32>
      %65 = vector.shape_cast %64 : vector<3x8x128xf32> to vector<3x1x8x128xf32>
      %cst_34 = arith.constant dense<0.000000e+00> : vector<3x8x128xf32>
      %66 = vector.multi_reduction <add>, %65, %cst_34 [1] : vector<3x1x8x128xf32> to vector<3x8x128xf32>
      %67 = arith.addf %61, %66 : vector<3x8x128xf32>
      %c0_35 = arith.constant 0 : index
      %c0_36 = arith.constant 0 : index
      %c0_37 = arith.constant 0 : index
      %68 = vector.load %arg6[%c0_35, %c0_36, %c0_37] : memref<3x8x128xf32, #tpu.memory_space<vmem>>, vector<3x8x128xf32>
      tpu.vector_store %arg6[%c0_35, %c0_36, %c0_37], %67 {strides = array<i32>} : memref<3x8x128xf32, #tpu.memory_space<vmem>>, vector<3x8x128xf32>,
    } else {
    }
    %true = arith.constant true
    %49 = arith.xori %46, %true : i1
    %50 = arith.extui %49 : i1 to i32
    %c0_i32_26 = arith.constant 0 : i32
    %51 = arith.cmpi ne, %50, %c0_i32_26 : i32
    scf.if %51 {
      %c0_30 = arith.constant 0 : index
      %c0_31 = arith.constant 0 : index
      %c0_32 = arith.constant 0 : index
      %57 = vector.load %arg6[%c0_30, %c0_31, %c0_32] : memref<3x8x128xf32, #tpu.memory_space<vmem>>, vector<3x8x128xf32>
      %58 = vector.shape_cast %18 : vector<3x8x128xf32> to vector<3x1x8x128xf32>
      %cst_33 = arith.constant dense<0.000000e+00> : vector<3x8x128xf32>
      %59 = vector.multi_reduction <add>, %58, %cst_33 [1] : vector<3x1x8x128xf32> to vector<3x8x128xf32>
      %60 = arith.addf %57, %59 : vector<3x8x128xf32>
      %c0_34 = arith.constant 0 : index
      %c0_35 = arith.constant 0 : index
      %c0_36 = arith.constant 0 : index
      %61 = vector.load %arg6[%c0_34, %c0_35, %c0_36] : memref<3x8x128xf32, #tpu.memory_space<vmem>>, vector<3x8x128xf32>
      tpu.vector_store %arg6[%c0_34, %c0_35, %c0_36], %60 {strides = array<i32>} : memref<3x8x128xf32, #tpu.memory_space<vmem>>, vector<3x8x128xf32>,
    } else {
    }
    %c1_i32_27 = arith.constant 1 : i32
    %52 = arith.cmpi eq, %arg0, %c1_i32_27 : i32
    %c0_i32_28 = arith.constant 0 : i32
    %53 = arith.cmpi eq, %arg1, %c0_i32_28 : i32
    %54 = arith.andi %52, %53 : i1
    %55 = arith.extui %54 : i1 to i32
    %c0_i32_29 = arith.constant 0 : i32
    %56 = arith.cmpi ne, %55, %c0_i32_29 : i32
    scf.if %56 {
      %c0_30 = arith.constant 0 : index
      %c0_31 = arith.constant 0 : index
      %c0_32 = arith.constant 0 : index
      %57 = vector.load %arg5[%c0_30, %c0_31, %c0_32] : memref<3x8x128xf32, #tpu.memory_space<vmem>>, vector<1x8x128xf32>
      %58 = vector.shape_cast %57 : vector<1x8x128xf32> to vector<8x128xf32>
      %59 = vector.shape_cast %58 : vector<8x128xf32> to vector<1x8x128xf32>
      %cst_33 = arith.constant dense<0.000000e+00> : vector<1xf32>
      %60 = vector.multi_reduction <add>, %59, %cst_33 [1, 2] : vector<1x8x128xf32> to vector<1xf32>
      %61 = vector.shape_cast %60 : vector<1xf32> to vector<1x1x1xf32>
      %62 = vector.extract %61[0, 0, 0] : f32 from vector<1x1x1xf32>
      %c0_34 = arith.constant 0 : index
      %c0_35 = arith.constant 0 : index
      %c0_36 = arith.constant 0 : index
      %63 = vector.load %arg6[%c0_34, %c0_35, %c0_36] : memref<3x8x128xf32, #tpu.memory_space<vmem>>, vector<1x8x128xf32>
      %64 = vector.shape_cast %63 : vector<1x8x128xf32> to vector<8x128xf32>
      %65 = vector.shape_cast %64 : vector<8x128xf32> to vector<1x8x128xf32>
      %cst_37 = arith.constant dense<0.000000e+00> : vector<1xf32>
      %66 = vector.multi_reduction <add>, %65, %cst_37 [1, 2] : vector<1x8x128xf32> to vector<1xf32>
      %67 = vector.shape_cast %66 : vector<1xf32> to vector<1x1x1xf32>
      %68 = vector.extract %67[0, 0, 0] : f32 from vector<1x1x1xf32>
      %c0_38 = arith.constant 0 : index
      %c0_39 = arith.constant 0 : index
      %c0_40 = arith.constant 0 : index
      %69 = vector.load %arg7[%c0_38, %c0_39, %c0_40] : memref<3x8x128xf32, #tpu.memory_space<vmem>>, vector<1x8x128xf32>
      %70 = vector.shape_cast %69 : vector<1x8x128xf32> to vector<8x128xf32>
      %71 = vector.shape_cast %70 : vector<8x128xf32> to vector<1x8x128xf32>
      %cst_41 = arith.constant dense<0.000000e+00> : vector<1xf32>
      %72 = vector.multi_reduction <add>, %71, %cst_41 [1, 2] : vector<1x8x128xf32> to vector<1xf32>
      %73 = vector.shape_cast %72 : vector<1xf32> to vector<1x1x1xf32>
      %74 = vector.extract %73[0, 0, 0] : f32 from vector<1x1x1xf32>
      %cst_42 = arith.constant 2.000000e+00 : f32
      %75 = arith.mulf %cst_42, %62 : f32
      %cst_43 = arith.constant 9.99999974E-6 : f32
      %76 = arith.addf %75, %cst_43 : f32
      %77 = arith.addf %68, %74 : f32
      %cst_44 = arith.constant 9.99999974E-6 : f32
      %78 = arith.addf %77, %cst_44 : f32
      %79 = arith.divf %76, %78 : f32
      %cst_45 = arith.constant 0.000000e+00 : f32
      %80 = arith.addf %cst_45, %79 : f32
      %c1 = arith.constant 1 : index
      %c0_46 = arith.constant 0 : index
      %c0_47 = arith.constant 0 : index
      %81 = vector.load %arg5[%c1, %c0_46, %c0_47] : memref<3x8x128xf32, #tpu.memory_space<vmem>>, vector<1x8x128xf32>
      %82 = vector.shape_cast %81 : vector<1x8x128xf32> to vector<8x128xf32>
      %83 = vector.shape_cast %82 : vector<8x128xf32> to vector<1x8x128xf32>
      %cst_48 = arith.constant dense<0.000000e+00> : vector<1xf32>
      %84 = vector.multi_reduction <add>, %83, %cst_48 [1, 2] : vector<1x8x128xf32> to vector<1xf32>
      %85 = vector.shape_cast %84 : vector<1xf32> to vector<1x1x1xf32>
      %86 = vector.extract %85[0, 0, 0] : f32 from vector<1x1x1xf32>
      %c1_49 = arith.constant 1 : index
      %c0_50 = arith.constant 0 : index
      %c0_51 = arith.constant 0 : index
      %87 = vector.load %arg6[%c1_49, %c0_50, %c0_51] : memref<3x8x128xf32, #tpu.memory_space<vmem>>, vector<1x8x128xf32>
      %88 = vector.shape_cast %87 : vector<1x8x128xf32> to vector<8x128xf32>
      %89 = vector.shape_cast %88 : vector<8x128xf32> to vector<1x8x128xf32>
      %cst_52 = arith.constant dense<0.000000e+00> : vector<1xf32>
      %90 = vector.multi_reduction <add>, %89, %cst_52 [1, 2] : vector<1x8x128xf32> to vector<1xf32>
      %91 = vector.shape_cast %90 : vector<1xf32> to vector<1x1x1xf32>
      %92 = vector.extract %91[0, 0, 0] : f32 from vector<1x1x1xf32>
      %c1_53 = arith.constant 1 : index
      %c0_54 = arith.constant 0 : index
      %c0_55 = arith.constant 0 : index
      %93 = vector.load %arg7[%c1_53, %c0_54, %c0_55] : memref<3x8x128xf32, #tpu.memory_space<vmem>>, vector<1x8x128xf32>
      %94 = vector.shape_cast %93 : vector<1x8x128xf32> to vector<8x128xf32>
      %95 = vector.shape_cast %94 : vector<8x128xf32> to vector<1x8x128xf32>
      %cst_56 = arith.constant dense<0.000000e+00> : vector<1xf32>
      %96 = vector.multi_reduction <add>, %95, %cst_56 [1, 2] : vector<1x8x128xf32> to vector<1xf32>
      %97 = vector.shape_cast %96 : vector<1xf32> to vector<1x1x1xf32>
      %98 = vector.extract %97[0, 0, 0] : f32 from vector<1x1x1xf32>
      %cst_57 = arith.constant 2.000000e+00 : f32
      %99 = arith.mulf %cst_57, %86 : f32
      %cst_58 = arith.constant 9.99999974E-6 : f32
      %100 = arith.addf %99, %cst_58 : f32
      %101 = arith.addf %92, %98 : f32
      %cst_59 = arith.constant 9.99999974E-6 : f32
      %102 = arith.addf %101, %cst_59 : f32
      %103 = arith.divf %100, %102 : f32
      %104 = arith.addf %80, %103 : f32
      %c2 = arith.constant 2 : index
      %c0_60 = arith.constant 0 : index
      %c0_61 = arith.constant 0 : index
      %105 = vector.load %arg5[%c2, %c0_60, %c0_61] : memref<3x8x128xf32, #tpu.memory_space<vmem>>, vector<1x8x128xf32>
      %106 = vector.shape_cast %105 : vector<1x8x128xf32> to vector<8x128xf32>
      %107 = vector.shape_cast %106 : vector<8x128xf32> to vector<1x8x128xf32>
      %cst_62 = arith.constant dense<0.000000e+00> : vector<1xf32>
      %108 = vector.multi_reduction <add>, %107, %cst_62 [1, 2] : vector<1x8x128xf32> to vector<1xf32>
      %109 = vector.shape_cast %108 : vector<1xf32> to vector<1x1x1xf32>
      %110 = vector.extract %109[0, 0, 0] : f32 from vector<1x1x1xf32>
      %c2_63 = arith.constant 2 : index
      %c0_64 = arith.constant 0 : index
      %c0_65 = arith.constant 0 : index
      %111 = vector.load %arg6[%c2_63, %c0_64, %c0_65] : memref<3x8x128xf32, #tpu.memory_space<vmem>>, vector<1x8x128xf32>
      %112 = vector.shape_cast %111 : vector<1x8x128xf32> to vector<8x128xf32>
      %113 = vector.shape_cast %112 : vector<8x128xf32> to vector<1x8x128xf32>
      %cst_66 = arith.constant dense<0.000000e+00> : vector<1xf32>
      %114 = vector.multi_reduction <add>, %113, %cst_66 [1, 2] : vector<1x8x128xf32> to vector<1xf32>
      %115 = vector.shape_cast %114 : vector<1xf32> to vector<1x1x1xf32>
      %116 = vector.extract %115[0, 0, 0] : f32 from vector<1x1x1xf32>
      %c2_67 = arith.constant 2 : index
      %c0_68 = arith.constant 0 : index
      %c0_69 = arith.constant 0 : index
      %117 = vector.load %arg7[%c2_67, %c0_68, %c0_69] : memref<3x8x128xf32, #tpu.memory_space<vmem>>, vector<1x8x128xf32>
      %118 = vector.shape_cast %117 : vector<1x8x128xf32> to vector<8x128xf32>
      %119 = vector.shape_cast %118 : vector<8x128xf32> to vector<1x8x128xf32>
      %cst_70 = arith.constant dense<0.000000e+00> : vector<1xf32>
      %120 = vector.multi_reduction <add>, %119, %cst_70 [1, 2] : vector<1x8x128xf32> to vector<1xf32>
      %121 = vector.shape_cast %120 : vector<1xf32> to vector<1x1x1xf32>
      %122 = vector.extract %121[0, 0, 0] : f32 from vector<1x1x1xf32>
      %cst_71 = arith.constant 2.000000e+00 : f32
      %123 = arith.mulf %cst_71, %110 : f32
      %cst_72 = arith.constant 9.99999974E-6 : f32
      %124 = arith.addf %123, %cst_72 : f32
      %125 = arith.addf %116, %122 : f32
      %cst_73 = arith.constant 9.99999974E-6 : f32
      %126 = arith.addf %125, %cst_73 : f32
      %127 = arith.divf %124, %126 : f32
      %128 = arith.addf %104, %127 : f32
      %cst_74 = arith.constant 3.000000e+00 : f32
      %129 = arith.divf %128, %cst_74 : f32
      %cst_75 = arith.constant 1.000000e+00 : f32
      %130 = arith.subf %cst_75, %129 : f32
      %131 = vector.broadcast %130 : f32 to vector<1x1xf32>
      %c0_76 = arith.constant 0 : index
      %c0_77 = arith.constant 0 : index
      %132 = vector.load %arg4[%c0_76, %c0_77] : memref<1x1xf32, #tpu.memory_space<vmem>>, vector<1x1xf32>
      tpu.vector_store %arg4[%c0_76, %c0_77], %131 {strides = array<i32>} : memref<1x1xf32, #tpu.memory_space<vmem>>, vector<1x1xf32>,
    } else {
    }
    return
  }
  func.func @transform_0(%arg0: i32, %arg1: i32) -> (i32, i32, i32, i32) {
    %c0_i32 = arith.constant 0 : i32
    %c0_i32_0 = arith.constant 0 : i32
    %c0_i32_1 = arith.constant 0 : i32
    return %arg0, %c0_i32, %arg1, %c0_i32_0 : i32, i32, i32, i32
  }
  func.func @transform_1(%arg0: i32, %arg1: i32) -> (i32, i32, i32) {
    %c0_i32 = arith.constant 0 : i32
    %c0_i32_0 = arith.constant 0 : i32
    return %arg0, %arg1, %c0_i32 : i32, i32, i32
  }
  func.func @transform_2(%arg0: i32, %arg1: i32) -> (i32, i32) {
    %c0_i32 = arith.constant 0 : i32
    %c0_i32_0 = arith.constant 0 : i32
    %c0_i32_1 = arith.constant 0 : i32
    return %c0_i32, %c0_i32_0 : i32, i32
  }
}

</mosaic_0001>

<bundles_post_ra>
// kernel: tpu_custom_call.1
= control target key start
LH: loop header
LB: loop body
LE: loop exit
PB: predicated region body
PF: predicated region fallthrough
CT: control target
= control target key end

     0   :  { %7 = vsyncpa [#allocation6], 0  ;;  %s1023_s0 = inlined_call_operand.hbm [shape: f32[2,3,8,128], index: 0, kind: input, shape index: {}]   ;;  %s1024_s1 = inlined_call_operand.hbm [shape: s32[2,8,128], index: 1, kind: input, shape index: {}]   ;;  %s1025_s2 = inlined_call_operand.hbm [shape: f32[1,1], index: 2, kind: output, shape index: {}]  }
   0x1   :  { %9 = vsyncpa [#allocation6 + $0x1], 0 }
   0x2   :  { %10 = vsyncpa [#allocation9], 0 }
   0x3   :  { %12 = vsyncpa [#allocation9 + $0x1], 0 }
   0x4   :  { %13 = vsyncpa [#allocation7], 0  ;;  %s898_s9 = smov 0   ;;  %s900_s10 = smov 0  }
   0x5   :  { %s902_s11 = smov 0   ;;  %s904_s12 = smov 0  }
   0x6   :  { %s906_s13 = smov 0   ;;  %s908_s14 = smov 0  }
   0x7 LB: > { %s592_s15 = sadd.s32 4294967295, %s875_s14   ;;  %s31_s16 = sadd.s32 1, %s871_s13  ;;  %s875_s14 = sphi %s908_s14, %s19_s14   ;;  %s871_s13 = sphi %s906_s13, %s1032_s13   ;;  %s867_s12 = sphi %s904_s12, %s1031_s12   ;;  %s863_s11 = sphi %s902_s11, %s1030_s11   ;;  %s859_s10 = sphi %s900_s10, %s1029_s10   ;;  %s855_s9 = sphi %s898_s9, %s1028_s9  }
   0x8   : > { %p33_p0 = scmp.ge.s32.totalorder %s31_s16, 2  ;;  %s40_s17 = sadd.s32 1, %s863_s11 }
   0x9   : > { %p47_p1 = scmp.ne.s32.totalorder %s863_s11, %s859_s10  ;;  %p48_p2 = scmp.eq.s32.totalorder %s875_s14, 0 }
   0xa   : > { %s1034_s16 = smov (%p33_p0, %s31_s16), 0  ;;  %p53_p4 = scmp.ne.s32.totalorder %s859_s10, %s855_s9 }
   0xb   : > { %p49_p3 = por %p48_p2, %p47_p1  ;;  %s35_s18 = ssub.s32 %s871_s13, %s1034_s16 }
   0xc   : > { %p54_p5 = scmp.eq.s32.totalorder %s592_s15, 0  ;;  %p38_p6 = scmp.eq.s32.totalorder %s35_s18, 0 }
   0xd   : > { %p656_p8 = scmp.lt.s32.totalorder %s875_s14, 2  ;;  %s126_s21 = sand.u32 1, %s863_s11  }
   0xe   : > { %p939_p7 = por %p54_p5, %p53_p4  ;;  %s613_s22 = smul.u32 24, %s871_s13 }
   0xf   : > { %s945_s20 = scalar_select %p38_p6, %s863_s11, %s40_s17  }
  0x10   : > { %s612_s23 = smul.u32 24, %s126_s21  ;;  %s136_s26 = scalar_lea.hbm %s1023_s0, %s613_s22 }
  0x11   : > { %p952_p9 = pnand %p656_p8, %p49_p3  ;;  %s137_s28 = sshll.u32 %s136_s26, 4  ;;  %s138_s28 = int_to_ptr.hbm [resolvable:$true] %s137_s28 }
  0x12   : > { %s130_s29 = scalar_lea.vmem [#allocation5], %s612_s23  ;;  %s127_s3 = scalar_lea.sflag [#allocation6], %s126_s21 }
  0x13   : > { %s139_s30 = sshll.u32 %s130_s29, 4  ;;  %s877_s4 = smov 128   ;;  %s140_s30 = int_to_ptr.vmem [resolvable:$true] %s139_s30 }
  0x14   : > { %s878_s5 = smov 8   ;;  %p598_p10 = scmp.ge.s32.totalorder %s875_s14, 1 }
  0x15   : > { %652 = dma.hbm_to_vmem [thread:$0]  (!%p952_p9), %s138_s28, 384, %s140_s30, %s127_s3, %s877_s4, %s877_s4, %s878_s5  }
  0x16   : > { %p167_p11 = scmp.lt.s32.totalorder %s875_s14, 3  ;;  %s596_s6 = sshll.u32 %s126_s21, 3 }
  0x17   : > { %s597_s7 = sshll.u32 %s871_s13, 3  ;;  %s153_s8 = scalar_lea.vmem [#allocation8], %s596_s6 }
  0x18   : > { %p168_p12 = pnand %p598_p10, %p167_p11  ;;  %s162_s9 = sshll.u32 %s153_s8, 4  ;;  %s163_s9 = int_to_ptr.vmem [resolvable:$true] %s162_s9 }
  0x19   : > { %s158_s22 = scalar_lea.hbm %s1024_s1, %s597_s7  ;;  %s150_s24 = scalar_lea.sflag [#allocation9], %s126_s21 }
  0x1a   : > { %s160_s23 = sshll.u32 %s158_s22, 4  ;;  %171 = sbr.rel (%p168_p12) target bundleno = 514 (0x202), region = 28  ;;  %s161_s23 = int_to_ptr.hbm [resolvable:$true] %s160_s23 }
  0x1b   : > { %655 = dma.hbm_to_vmem [thread:$0]  (!%p952_p9), %s161_s23, 128, %s163_s9, %s150_s24  }
  0x1c   : > { %s173_s25 = sand.u32 (!%p168_p12), 1, %s859_s10  }
  0x1d   : > { %s614_s26 = smul.u32 (!%p168_p12), 24, %s173_s25  ;;  %s174_s28 = scalar_lea.sflag (!%p168_p12), [#allocation6], %s173_s25 }
  0x1f   : > { %s177_s29 = scalar_lea.vmem [#allocation5], %s614_s26 }
  0x20   : > { %842 = dma.done.wait (%p939_p7), %s174_s28, 384  }
  0x21   : > { %844 = vsyncadd (%p939_p7), %s174_s28, 4294966912  ;;  %s599_s30 = sshll.u32 %s173_s25, 3  ;;  %s184_s3 = scalar_lea.sflag [#allocation9], %s173_s25 }
  0x22   : > { %s187_s4 = scalar_lea.vmem [#allocation8], %s599_s30 }
  0x23   : > { %846 = dma.done.wait (%p939_p7), %s184_s3, 128  }
  0x24   : > { %848 = vsyncadd (%p939_p7), %s184_s3, 4294967168  ;;  %p209_p13 = scmp.eq.s32.totalorder %s867_s12, 0 }
  0x25   : > { %v879_v0 = vmov (%p209_p13), 0.0  }
  0x26   : > { %214 = sbr.rel (!%p209_p13) target bundleno = 47 (0x2f), region = 40  ;;  %215 = vst [vmem:[#allocation2 + $0x10] sm:$0xff] (%p209_p13), %v879_v0 }
  0x27   : > { %216 = vst [vmem:[#allocation2] sm:$0xff] (%p209_p13), %v879_v0 }
  0x28   : > { %217 = vst [vmem:[#allocation2 + $0x8] sm:$0xff] (%p209_p13), %v879_v0 }
  0x29   : > { %218 = vst [vmem:[#allocation3 + $0x8] sm:$0xff] (%p209_p13), %v879_v0 }
  0x2a   : > { %219 = vst [vmem:[#allocation3] sm:$0xff] (%p209_p13), %v879_v0 }
  0x2b   : > { %220 = vst [vmem:[#allocation3 + $0x10] sm:$0xff] %v879_v0 }
  0x2c   : > { %221 = vst [vmem:[#allocation4 + $0x10] sm:$0xff] %v879_v0 }
  0x2d   : > { %222 = vst [vmem:[#allocation4] sm:$0xff] %v879_v0 }
  0x2e   : > { %223 = vst [vmem:[#allocation4 + $0x8] sm:$0xff] %v879_v0 }
  0x2f PF: > { %v224_v1 = vld [vmem:[%s177_s29] sm:$0xff]  ;;  %v225_v2 = vld [vmem:[%s177_s29 + $0x8] sm:$0xff]  ;;  %v226_v3 = vld [vmem:[%s177_s29 + $0x10] sm:$0xff]  ;;  %p318_p0 = scmp.eq.s32.totalorder %s867_s12, 1  ;;  %v880_v9 = vmov 0.0  }
  0x30   : > { %v227_v4 = vld [vmem:[%s187_s4] sm:$0xff]  ;;  %v228_v5 = vmax.f32 %v224_v1, %v225_v2 }
  0x31   : > { %vm245_vm0 = vcmp.eq.s32.totalorder %v227_v4, 0  ;;  %vm248_vm1 = vcmp.eq.s32.totalorder %v227_v4, 1  ;;  %vm251_vm2 = vcmp.eq.s32.totalorder %v227_v4, 2  ;;  %vm284_vm3 = vcmp.ge.s32.totalorder %v227_v4, 0  ;;  %v254_v33 = vld [vmem:[#allocation2 + $0x10] sm:$0xff] }
  0x32   : > { %v229_v8 = vmax.f32 %v228_v5, %v226_v3  ;;  %v601_v10 = vsel %vm245_vm0, 1.0, %v880_v9  ;;  %v602_v11 = vsel %vm248_vm1, 1.0, %v880_v9  ;;  %v603_v13 = vsel %vm251_vm2, 1.0, %v880_v9  ;;  %v255_v34 = vld [vmem:[#allocation2] sm:$0xff] }
  0x33   : > { %v269_v6 = vld [vmem:[#allocation4 + $0x10] sm:$0xff]  ;;  %v604_v29 = vsel %vm284_vm3, 1.0, %v880_v9  ;;  %v256_v35 = vld [vmem:[#allocation2 + $0x8] sm:$0xff]  ;;  %vm496_vm1 = vcmask (%p318_p0), 0  }
  0x34   : > { %v270_v7 = vld [vmem:[#allocation4] sm:$0xff]  ;;  %v275_v14 = vadd.f32 %v601_v10, %v269_v6  ;;  %v230_v16 = vsub.f32 %v224_v1, %v229_v8  ;;  %v231_v17 = vsub.f32 %v225_v2, %v229_v8  ;;  %v232_v18 = vsub.f32 %v226_v3, %v229_v8  ;;  %v287_v39 = vld [vmem:[#allocation3 + $0x8] sm:$0xff] }
  0x35   : > { %v271_v12 = vld [vmem:[#allocation4 + $0x8] sm:$0xff]  ;;  %v276_v15 = vadd.f32 %v602_v11, %v270_v7 }
  0x36   : > { %v277_v19 = vadd.f32 %v603_v13, %v271_v12  ;;  %278 = vst [vmem:[#allocation4 + $0x10] sm:$0xff] %v275_v14  ;;  %v233_v20 = vmul.f32 1.442695, %v230_v16  ;;  %v235_v21 = vmul.f32 1.442695, %v231_v17  ;;  %v288_v41 = vld [vmem:[#allocation3] sm:$0xff] }
  0x37   : > { %v237_v22 = vmul.f32 1.442695, %v232_v18  ;;  %279 = vst [vmem:[#allocation4] sm:$0xff] %v276_v15  ;;  %v289_v47 = vld [vmem:[#allocation3 + $0x10] sm:$0xff] }
  0x38   : > { %713 = vpow2.f32 %v233_v20  ;;  %280 = vst [vmem:[#allocation4 + $0x8] sm:$0xff] %v277_v19 }
  0x39   : > { %715 = vpow2.f32 %v235_v21 }
  0x3a   : > { %717 = vpow2.f32 %v237_v22 }
  0x3d   : > { %v343_v52 = vld [vmem:[#allocation4 + $0x10] sm:$0xff] (%p318_p0) }
  0x3e   : > { %v714_v23 = vpop.eup %713  ;;  %344 = vadd.xlane.f32.xlu1 (%p318_p0), %v343_v52  ;;  %v398_v56 = vld [vmem:[#allocation4] sm:$0xff] (%p318_p0) }
  0x3f   : > { %v716_v24 = vpop.eup %715  ;;  %v453_v57 = vld [vmem:[#allocation4 + $0x8] sm:$0xff] (%p318_p0) }
  0x40   : > { %v718_v25 = vpop.eup %717  ;;  %v239_v26 = vadd.f32 %v716_v24, %v714_v23 }
  0x42   : > { %v240_v27 = vadd.f32 %v718_v25, %v239_v26 }
  0x44   : > { %719 = vrcp.f32 %v240_v27 }
  0x4a   : > { %v720_v28 = vpop.eup %719 }
  0x4b   : > { %v242_v30 = vmul.f32 %v720_v28, %v714_v23  ;;  %v243_v31 = vmul.f32 %v720_v28, %v716_v24  ;;  %v244_v32 = vmul.f32 %v720_v28, %v718_v25 }
  0x4d   : > { %v257_v36 = vmul.f32 %v601_v10, %v242_v30  ;;  %v258_v37 = vmul.f32 %v602_v11, %v243_v31  ;;  %v259_v38 = vmul.f32 %v603_v13, %v244_v32  ;;  %v290_v40 = vmul.f32 %v604_v29, %v242_v30 }
  0x4e   : > { %v291_v42 = vmul.f32 %v604_v29, %v243_v31  ;;  %v292_v43 = vmul.f32 %v604_v29, %v244_v32 }
  0x4f   : > { %v263_v44 = vadd.f32 %v257_v36, %v254_v33  ;;  %v264_v45 = vadd.f32 %v258_v37, %v255_v34  ;;  %v265_v46 = vadd.f32 %v259_v38, %v256_v35  ;;  %v296_v48 = vadd.f32 %v290_v40, %v287_v39 }
  0x50   : > { %v297_v49 = vadd.f32 %v291_v42, %v288_v41  ;;  %v298_v50 = vadd.f32 %v292_v43, %v289_v47 }
  0x51   : > { %266 = vst [vmem:[#allocation2 + $0x10] sm:$0xff] %v263_v44 }
  0x52   : > { %267 = vst [vmem:[#allocation2] sm:$0xff] %v264_v45  ;;  %322 = sbr.rel (!%p318_p0) target bundleno = 508 (0x1fc), region = 52 }
  0x53   : > { %268 = vst [vmem:[#allocation2 + $0x8] sm:$0xff] %v265_v46 }
  0x54   : > { %299 = vst [vmem:[#allocation3 + $0x8] sm:$0xff] %v296_v48 }
  0x55   : > { %300 = vst [vmem:[#allocation3] sm:$0xff] %v297_v49 }
  0x56   : > { %301 = vst [vmem:[#allocation3 + $0x10] sm:$0xff] %v298_v50 }
  0x58   : > { %v323_v51 = vld [vmem:[#allocation2 + $0x10] sm:$0xff] }
  0x59   : > { %324 = vadd.xlane.f32.xlu0 %v323_v51  ;;  %v376_v55 = vld [vmem:[#allocation2] sm:$0xff] }
  0x5a   : > { %377 = vadd.xlane.f32.xlu1 %v376_v55  ;;  %v431_v59 = vld [vmem:[#allocation2 + $0x8] sm:$0xff] }
  0x5b   : > { %v333_v54 = vld [vmem:[#allocation3 + $0x8] sm:$0xff] }
  0x5c   : > { %v387_v53 = vld [vmem:[#allocation3] sm:$0xff] }
  0x5d   : > { %388 = vadd.xlane.f32.xlu2 %v387_v53  ;;  %v442_v58 = vld [vmem:[#allocation3 + $0x10] sm:$0xff] }
  0x61   : > { %334 = vadd.xlane.f32.xlu0 %v333_v54 }
  0x62   : > { %443 = vadd.xlane.f32.xlu1 %v442_v58 }
  0x65   : > { %399 = vadd.xlane.f32.xlu2 %v398_v56 }
  0x69   : > { %432 = vadd.xlane.f32.xlu0 %v431_v59 }
  0x6d   : > { %454 = vadd.xlane.f32.xlu2 %v453_v57 }
  0xb1   : > { %v345_v61 = vpop.xlane.xlu1 %344 }
  0xb2   : > { %v346_v63 = vrot.slane %v345_v61, 4 }
  0xb4   : > { %v347_v1 = vadd.f32 %v346_v63, %v345_v61 }
  0xb6   : > { %v348_v4 = vrot.slane %v347_v1, 2 }
  0xb8   : > { %v349_v10 = vadd.f32 %v348_v4, %v347_v1 }
  0xba   : > { %v350_v13 = vrot.slane %v349_v10, 1 }
  0xbc   : > { %v351_v16 = vadd.f32 %v350_v13, %v349_v10 }
  0xcc   : > { %v325_v60 = vpop.xlane.xlu0 %324 }
  0xcd   : > { %v326_v62 = vrot.slane %v325_v60, 4  ;;  %v378_v18 = vpop.xlane.xlu1 %377 }
  0xce   : > { %v379_v20 = vrot.slane %v378_v18, 4 }
  0xcf   : > { %v327_v0 = vadd.f32 %v326_v62, %v325_v60 }
  0xd0   : > { %v389_v17 = vpop.xlane.xlu2 %388  ;;  %v380_v24 = vadd.f32 %v379_v20, %v378_v18 }
  0xd1   : > { %v328_v2 = vrot.slane %v327_v0, 2  ;;  %v390_v21 = vrot.slane %v389_v17, 4 }
  0xd2   : > { %v381_v27 = vrot.slane %v380_v24, 2 }
  0xd3   : > { %v329_v3 = vadd.f32 %v328_v2, %v327_v0  ;;  %v391_v25 = vadd.f32 %v390_v21, %v389_v17  ;;  %v881_v17 = vmov 3.0  }
  0xd4   : > { %v335_v5 = vpop.xlane.xlu0 %334  ;;  %v382_v32 = vadd.f32 %v381_v27, %v380_v24 }
  0xd5   : > { %v336_v6 = vrot.slane %v335_v5, 4  ;;  %v330_v7 = vrot.slane %v329_v3, 1  ;;  %v392_v28 = vrot.slane %v391_v25, 2  ;;  %v444_v50 = vpop.xlane.xlu1 %443 }
  0xd6   : > { %v383_v39 = vrot.slane %v382_v32, 1  ;;  %v445_v53 = vrot.slane %v444_v50, 4 }
  0xd7   : > { %v337_v8 = vadd.f32 %v336_v6, %v335_v5  ;;  %v331_v9 = vadd.f32 %v330_v7, %v329_v3  ;;  %v393_v34 = vadd.f32 %v392_v28, %v391_v25 }
  0xd8   : > { %v400_v19 = vpop.xlane.xlu2 %399  ;;  %v384_v46 = vadd.f32 %v383_v39, %v382_v32  ;;  %v446_v57 = vadd.f32 %v445_v53, %v444_v50 }
  0xd9   : > { %v338_v11 = vrot.slane %v337_v8, 2  ;;  %615 = vpush %v331_v9  ;;  %v401_v22 = vrot.slane %v400_v19, 4  ;;  %v394_v41 = vrot.slane %v393_v34, 1 }
  0xda   : > { %v447_v60 = vrot.slane %v446_v57, 2 }
  0xdb   : > { %v339_v12 = vadd.f32 %v338_v11, %v337_v8  ;;  %v402_v26 = vadd.f32 %v401_v22, %v400_v19  ;;  %v395_v47 = vadd.f32 %v394_v41, %v393_v34 }
  0xdc   : > { %v433_v49 = vpop.xlane.xlu0 %432  ;;  %v448_v2 = vadd.f32 %v447_v60, %v446_v57 }
  0xdd   : > { %v340_v14 = vrot.slane %v339_v12, 1  ;;  %v403_v30 = vrot.slane %v402_v26, 2  ;;  %v434_v52 = vrot.slane %v433_v49, 4 }
  0xde   : > { %v449_v9 = vrot.slane %v448_v2, 1 }
  0xdf   : > { %v341_v15 = vadd.f32 %v340_v14, %v339_v12  ;;  %v404_v36 = vadd.f32 %v403_v30, %v402_v26  ;;  %v435_v56 = vadd.f32 %v434_v52, %v433_v49 }
  0xe0   : > { %v455_v51 = vpop.xlane.xlu2 %454 }
  0xe1   : > { %617 = vpush %v341_v15  ;;  %v405_v43 = vrot.slane %v404_v36, 1  ;;  %v456_v54 = vrot.slane %v455_v51, 4  ;;  %v436_v59 = vrot.slane %v435_v56, 2  ;;  %v450_v15 = vadd.f32 %v449_v9, %v448_v2 }
  0xe2   : > { %619 = vpush %v351_v16 }
  0xe3   : > { %v406_v48 = vadd.f32 %v405_v43, %v404_v36  ;;  %v457_v58 = vadd.f32 %v456_v54, %v455_v51  ;;  %v437_v0 = vadd.f32 %v436_v59, %v435_v56 }
  0xe5   : > { %v458_v62 = vrot.slane %v457_v58, 2  ;;  %v438_v7 = vrot.slane %v437_v0, 1 }
  0xe7   : > { %v459_v3 = vadd.f32 %v458_v62, %v457_v58  ;;  %v439_v14 = vadd.f32 %v438_v7, %v437_v0 }
  0xe9   : > { %v460_v11 = vrot.slane %v459_v3, 1 }
  0xeb   : > { %v461_v16 = vadd.f32 %v460_v11, %v459_v3 }
 0x10a   : > { %s979_s12 = spop %615 }
 0x10b   : > { %s353_s6 = smul.f32 2.0, %s979_s12 }
 0x10d   : > { %s982_s7 = sadd.f32 1e-05, %s353_s6 }
 0x112   : > { %s618_s19 = spop %617 }
 0x113   : > { %s620_s21 = spop %619 }
 0x114   : > { %s355_s27 = sadd.f32 %s620_s21, %s618_s19 }
 0x116   : > { %s356_s5 = sadd.f32 1e-05, %s355_s27 }
 0x118   : > { %v357_v23 = vstv %s356_s5 }
 0x119   : > { %721 = vrcp.f32 %v357_v23  ;;  %v369_v35 = vand.u32 2147483648, %v357_v23  ;;  %v367_v38 = vand.u32 2147483647, %v357_v23  ;;  %vm363_vm5 = vweird.f32 %v357_v23 }
 0x11b   : > { %v370_v42 = vor.u32 1.1754944e-38, %v369_v35  ;;  %vm368_vm7 = vcmp.eq.f32.partialorder %v367_v38, 8.507059e+37 }
 0x11f   : > { %v722_v29 = vpop.eup %721 }
 0x120   : > { %v359_v31 = vmul.f32 %v722_v29, %v357_v23  ;;  %vm364_vm4 = vweird.f32 %v722_v29 }
 0x121   : > { %vm365_vm6 = vmor %vm363_vm5, %vm364_vm4 }
 0x122   : > { %v360_v33 = vsub.f32 1.0, %v359_v31 }
 0x124   : > { %v361_v37 = vmul.f32 %v722_v29, %v360_v33 }
 0x126   : > { %v362_v40 = vadd.f32 %v722_v29, %v361_v37 }
 0x128   : > { %v366_v44 = vsel %vm365_vm6, %v722_v29, %v362_v40 }
 0x129   : > { %v371_v45 = vsel %vm368_vm7, %v370_v42, %v366_v44 }
 0x12a   : > { %621 = vpush %v371_v45 }
 0x12b   : > { %623 = vpush %v384_v46 }
 0x12c   : > { %625 = vpush %v395_v47 }
 0x12d   : > { %627 = vpush %v406_v48 }
 0x15b   : > { %s984_s8 = spop %621 }
 0x15c   : > { %s373_s9 = smul.f32 %s984_s8, %s982_s7  ;;  %s988_s17 = spop %623 }
 0x15d   : > { %s626_s18 = spop %625  ;;  %s408_s25 = smul.f32 2.0, %s988_s17 }
 0x15e   : > { %s628_s22 = spop %627 }
 0x15f   : > { %s410_s23 = sadd.f32 %s628_s22, %s626_s18 }
 0x160   : > { %s409_s26 = sadd.f32 1e-05, %s408_s25 }
 0x161   : > { %s411_s24 = sadd.f32 1e-05, %s410_s23 }
 0x163   : > { %v412_v55 = vstv %s411_s24 }
 0x164   : > { %723 = vrcp.f32 %v412_v55  ;;  %v424_v4 = vand.u32 2147483648, %v412_v55  ;;  %v422_v6 = vand.u32 2147483647, %v412_v55  ;;  %vm418_vm9 = vweird.f32 %v412_v55 }
 0x165   : > { %725 = vrcp.f32 %v881_v17 }
 0x166   : > { %v425_v10 = vor.u32 1.1754944e-38, %v424_v4  ;;  %vm423_vm11 = vcmp.eq.f32.partialorder %v422_v6, 8.507059e+37 }
 0x16a   : > { %v724_v61 = vpop.eup %723 }
 0x16b   : > { %v414_v63 = vmul.f32 %v724_v61, %v412_v55  ;;  %vm419_vm8 = vweird.f32 %v724_v61  ;;  %v726_v18 = vpop.eup %725 }
 0x16c   : > { %vm420_vm10 = vmor %vm418_vm9, %vm419_vm8  ;;  %v486_v20 = vmul.f32 3.0, %v726_v18  ;;  %vm490_vm13 = vweird.f32 %v726_v18 }
 0x16d   : > { %v415_v1 = vsub.f32 1.0, %v414_v63 }
 0x16e   : > { %v487_v21 = vsub.f32 1.0, %v486_v20 }
 0x16f   : > { %v416_v5 = vmul.f32 %v724_v61, %v415_v1 }
 0x170   : > { %v488_v24 = vmul.f32 %v726_v18, %v487_v21 }
 0x171   : > { %v417_v8 = vadd.f32 %v724_v61, %v416_v5 }
 0x172   : > { %v489_v29 = vadd.f32 %v726_v18, %v488_v24 }
 0x173   : > { %v421_v12 = vsel %vm420_vm10, %v724_v61, %v417_v8 }
 0x174   : > { %v426_v13 = vsel %vm423_vm11, %v425_v10, %v421_v12  ;;  %v491_v33 = vsel %vm490_vm13, %v726_v18, %v489_v29 }
 0x175   : > { %629 = vpush %v426_v13 }
 0x176   : > { %631 = vpush %v439_v14 }
 0x177   : > { %633 = vpush %v450_v15 }
 0x178   : > { %635 = vpush %v461_v16 }
 0x1a6   : > { %s630_s28 = spop %629 }
 0x1a7   : > { %s428_s29 = smul.f32 %s630_s28, %s409_s26  ;;  %s991_s30 = spop %631 }
 0x1a8   : > { %s634_s3 = spop %633  ;;  %s463_s27 = smul.f32 2.0, %s991_s30 }
 0x1a9   : > { %s996_s4 = sadd.f32 %s428_s29, %s373_s9  ;;  %s636_s12 = spop %635 }
 0x1aa   : > { %s465_s19 = sadd.f32 %s636_s12, %s634_s3 }
 0x1ab   : > { %s464_s5 = sadd.f32 1e-05, %s463_s27 }
 0x1ac   : > { %s466_s21 = sadd.f32 1e-05, %s465_s19 }
 0x1ae   : > { %v467_v19 = vstv %s466_s21 }
 0x1af   : > { %727 = vrcp.f32 %v467_v19  ;;  %v479_v26 = vand.u32 2147483648, %v467_v19  ;;  %v477_v28 = vand.u32 2147483647, %v467_v19  ;;  %vm473_vm14 = vweird.f32 %v467_v19 }
 0x1b1   : > { %v480_v31 = vor.u32 1.1754944e-38, %v479_v26  ;;  %vm478_vm0 = vcmp.eq.f32.partialorder %v477_v28, 8.507059e+37 }
 0x1b5   : > { %v728_v22 = vpop.eup %727 }
 0x1b6   : > { %v469_v23 = vmul.f32 %v728_v22, %v467_v19  ;;  %vm474_vm12 = vweird.f32 %v728_v22 }
 0x1b7   : > { %vm475_vm15 = vmor %vm473_vm14, %vm474_vm12 }
 0x1b8   : > { %v470_v25 = vsub.f32 1.0, %v469_v23 }
 0x1ba   : > { %v471_v27 = vmul.f32 %v728_v22, %v470_v25 }
 0x1bc   : > { %v472_v30 = vadd.f32 %v728_v22, %v471_v27 }
 0x1be   : > { %v476_v32 = vsel %vm475_vm15, %v728_v22, %v472_v30 }
 0x1bf   : > { %v481_v34 = vsel %vm478_vm0, %v480_v31, %v476_v32 }
 0x1c0   : > { %637 = vpush %v481_v34 }
 0x1c1   : > { %639 = vpush %v491_v33 }
 0x1f1   : > { %s638_s6 = spop %637 }
 0x1f2   : > { %s483_s7 = smul.f32 %s638_s6, %s464_s5  ;;  %s640_s8 = spop %639 }
 0x1f4   : > { %s484_s9 = sadd.f32 %s483_s7, %s996_s4 }
 0x1f6   : > { %s493_s17 = smul.f32 %s640_s8, %s484_s9 }
 0x1f8   : > { %s494_s18 = ssub.f32 1.0, %s493_s17 }
 0x1fa   : > { %v495_v35 = vstv %s494_s18 }
 0x1fb   : > { %497 = vst.msk [vmem:[#allocation10] sm:$0x1] %vm496_vm1, %v495_v35 }
 0x1fc PF: > { %p657_p1 = scmp.eq.s32.totalorder %s592_s15, 1  ;;  %s506_s24 = sshll.u32 %s1025_s2, 4  ;;  %s507_s24 = int_to_ptr.hbm [resolvable:$true] %s506_s24 }
 0x1fd   : > { %s882_s25 = smov [#allocation10]  }
 0x1fe   : > { %s504_s26 = sshll.u32 %s882_s25, 4  ;;  %s505_s26 = int_to_ptr.vmem [resolvable:$true] %s504_s26 }
 0x1ff   : > { %646 = dma.vmem_to_hbm [thread:$0]  (%p657_p1), %s505_s26, 16, %s507_s24, [#allocation7]  }
 0x200   : > { %850 = dma.done.wait (%p657_p1), [#allocation7], 16  }
 0x201   : > { %852 = vsyncadd (%p657_p1), [#allocation7], 4294967280 }
 0x202 PF: > { %s19_s14 = sadd.s32 1, %s875_s14   ;;  %s1028_s9 = smov %s859_s10 }
 0x203   : > { %p16_p2 = scmp.ge.s32.totalorder %s19_s14, 4   ;;  %s1029_s10 = smov %s863_s11 }
 0x204   : > { %s1030_s11 = smov %s945_s20  ;;  %s1031_s12 = smov %s871_s13 }
 0x205   : > { %s1032_s13 = smov %s1034_s16  ;;  %18 = sbr.rel (!%p16_p2) target bundleno = 7 (0x7), region = 100 }
 0x20a   :  { %520 = vsyncpa [#allocation6], 1 }
 0x20b   :  { %522 = vsyncpa [#allocation6 + $0x1], 1 }
 0x20c   :  { %523 = vsyncpa [#allocation9], 1 }
 0x20d   :  { %525 = vsyncpa [#allocation9 + $0x1], 1 }
 0x20e   :  { %526 = vsyncpa [#allocation7], 1 }
 0x20f   :  { %528 = vsyncpa [#allocation7 + $0x1], 1 }

</bundles_post_ra>
